<compile_context>
chip_gen: v6e
topology: v6e:2x2x1
jax: 0.10.0
libtpu: 0.0.40
codegen_flags: <defaults>
</compile_context>

<pallas_src>
import functools

import jax
import jax.numpy as jnp
from jax import lax
from jax.experimental import pallas as pl
from jax.experimental.pallas import tpu as pltpu


def _mha_kernel(xq_ref, xkv_ref,
                wq_ref, bq_ref, wk_ref, bk_ref, wv_ref, bv_ref,
                wo_ref, bo_ref,
                o_ref,
                k_cache, v_cache, acc_ref,
                *, emb_size, num_heads):
    """One grid step == one (batch, query-tile, head)."""
    qi = pl.program_id(1)
    h = pl.program_id(2)
    inv_scale = 1.0 / (emb_size ** 0.5)  # PyTorch module scales by sqrt(emb_size)

    cdtype = xq_ref.dtype

    xq = xq_ref[0]                       # (tq, E)
    wq = wq_ref[0]                       # (E, d)  -- pre-transposed, per head
    bq = bq_ref[0]                       # (1, d)

    # Query projection for this (query tile, head); scaling folded into q.
    q = (jnp.dot(xq, wq, preferred_element_type=jnp.float32) + bq) * inv_scale
    q = q.astype(cdtype)

    # K/V projection for this head: computed once per (batch, head) at the
    # first query tile, cached in VMEM scratch for subsequent query tiles.
    @pl.when(qi == 0)
    def _():
        xkv = xkv_ref[0]                 # (N, E)
        k_full = jnp.dot(xkv, wk_ref[0], preferred_element_type=jnp.float32) + bk_ref[0]
        v_full = jnp.dot(xkv, wv_ref[0], preferred_element_type=jnp.float32) + bv_ref[0]
        k_cache[h] = k_full.astype(cdtype)
        v_cache[h] = v_full.astype(cdtype)

    k = k_cache[h]                       # (N, d)
    v = v_cache[h]                       # (N, d)

    # energy = q @ k^T, contracting on the head dim of both (no transpose).
    energy = lax.dot_general(q, k, (((1,), (1,)), ((), ())),
                             preferred_element_type=jnp.float32)   # (tq, N)

    # Softmax in f32; denominator via the EUP approximate reciprocal.
    m = jnp.max(energy, axis=-1, keepdims=True)
    p = jnp.exp(energy - m)
    denom = jnp.sum(p, axis=-1, keepdims=True)
    att = p * pl.reciprocal(denom, approx=True)

    out_h = jnp.dot(att.astype(cdtype), v,
                    preferred_element_type=jnp.float32)            # (tq, d)

    # Accumulate this head's contribution to the output projection.
    @pl.when(h == 0)
    def _():
        acc_ref[...] = jnp.zeros_like(acc_ref)

    acc_ref[...] += jnp.dot(out_h.astype(cdtype), wo_ref[0],
                            preferred_element_type=jnp.float32)    # (tq, E)

    @pl.when(h == pl.num_programs(2) - 1)
    def _():
        o_ref[0] = (acc_ref[...] + bo_ref[...]).astype(o_ref.dtype)


def multi_head_attention(x, params, *, emb_size, num_heads, q_tile=None):
    B, N, E = x.shape
    assert E == emb_size and E % num_heads == 0
    d = E // num_heads

    wq, bq, wk, bk, wv, bv, wo, bo = params

    # Host-side re-layout (free): pre-transpose to (in, out) and split heads so
    # the kernel never transposes weights or slices/concats the lane axis.
    def split_in_heads(w):               # torch (out, in) -> (H, in, d)
        return jnp.transpose(w.T.reshape(E, num_heads, d), (1, 0, 2))

    wq_h = split_in_heads(wq)
    wk_h = split_in_heads(wk)
    wv_h = split_in_heads(wv)
    bq_h = bq.reshape(num_heads, 1, d)
    bk_h = bk.reshape(num_heads, 1, d)
    bv_h = bv.reshape(num_heads, 1, d)
    wo_h = wo.T.reshape(num_heads, d, E)  # (H, d, E): per-head output projection
    bo_2 = bo.reshape(1, E)

    # Query-tile size: full N for small sequences; multiples of 8 otherwise.
    tq = N if q_tile is None else q_tile
    assert N % tq == 0 and (tq == N or tq % 8 == 0)
    nq = N // tq

    kernel = functools.partial(_mha_kernel, emb_size=emb_size, num_heads=num_heads)

    head_block = lambda shape: pl.BlockSpec(shape, lambda b, qi, h: (h, 0, 0))

    return pl.pallas_call(
        kernel,
        out_shape=jax.ShapeDtypeStruct((B, N, E), x.dtype),
        grid_spec=pltpu.PrefetchScalarGridSpec(
            num_scalar_prefetch=0,
            grid=(B, nq, num_heads),
            in_specs=[
                pl.BlockSpec((1, tq, E), lambda b, qi, h: (b, qi, 0)),  # x (query rows)
                pl.BlockSpec((1, N, E), lambda b, qi, h: (b, 0, 0)),    # x (key/value rows)
                head_block((1, E, d)), head_block((1, 1, d)),           # Wq, bq (per head)
                head_block((1, E, d)), head_block((1, 1, d)),           # Wk, bk
                head_block((1, E, d)), head_block((1, 1, d)),           # Wv, bv
                head_block((1, d, E)),                                  # Wo (per head)
                pl.BlockSpec((1, E), lambda b, qi, h: (0, 0)),          # bo
            ],
            out_specs=pl.BlockSpec((1, tq, E), lambda b, qi, h: (b, qi, 0)),
            scratch_shapes=[
                pltpu.VMEM((num_heads, N, d), x.dtype),   # per-head K cache
                pltpu.VMEM((num_heads, N, d), x.dtype),   # per-head V cache
                pltpu.VMEM((tq, E), jnp.float32),         # output-proj accumulator
            ],
        ),
        compiler_params=pltpu.CompilerParams(
            dimension_semantics=("parallel", "arbitrary", "arbitrary")),
    )(x, x, wq_h, bq_h, wk_h, bk_h, wv_h, bv_h, wo_h, bo_2)


def reference_mha(x, params, *, emb_size, num_heads):
    """Pure-JAX reference mirroring the PyTorch forward."""
    wq, bq, wk, bk, wv, bv, wo, bo = params
    B, N, E = x.shape
    d = E // num_heads
    q = x @ wq.T + bq
    k = x @ wk.T + bk
    v = x @ wv.T + bv
    reshape_heads = lambda t: t.reshape(B, N, num_heads, d).transpose(0, 2, 1, 3)
    q, k, v = reshape_heads(q), reshape_heads(k), reshape_heads(v)
    energy = jnp.einsum('bhqd,bhkd->bhqk', q, k)
    att = jax.nn.softmax(energy / (emb_size ** 0.5), axis=-1)
    out = jnp.einsum('bhal,bhlv->bhav', att, v)
    out = out.transpose(0, 2, 1, 3).reshape(B, N, E)
    return out @ wo.T + bo


if __name__ == "__main__":
    B, N = 2, 8
    emb_size, num_heads = 32, 4

    key = jax.random.PRNGKey(0)
    ks = jax.random.split(key, 9)
    scale = 0.1
    x = jax.random.normal(ks[0], (B, N, emb_size), dtype=jnp.float32)
    params = (
        scale * jax.random.normal(ks[1], (emb_size, emb_size), dtype=jnp.float32),  # Wq
        scale * jax.random.normal(ks[2], (emb_size,), dtype=jnp.float32),            # bq
        scale * jax.random.normal(ks[3], (emb_size, emb_size), dtype=jnp.float32),   # Wk
        scale * jax.random.normal(ks[4], (emb_size,), dtype=jnp.float32),            # bk
        scale * jax.random.normal(ks[5], (emb_size, emb_size), dtype=jnp.float32),   # Wv
        scale * jax.random.normal(ks[6], (emb_size,), dtype=jnp.float32),            # bv
        scale * jax.random.normal(ks[7], (emb_size, emb_size), dtype=jnp.float32),   # Wo
        scale * jax.random.normal(ks[8], (emb_size,), dtype=jnp.float32),            # bo
    )

    out = multi_head_attention(x, params, emb_size=emb_size, num_heads=num_heads)
    out = jax.block_until_ready(out)

    ref = reference_mha(x, params, emb_size=emb_size, num_heads=num_heads)
    assert out.shape == (B, N, emb_size)
    # Tolerance accounts for the approximate (EUP) softmax reciprocal.
    assert jnp.allclose(out, ref, atol=5e-3, rtol=5e-3), "mismatch vs reference"

    print("KERNEL_OK")
</pallas_src>

<mosaic_0001>
module attributes {stable_mosaic.version = 11 : i64} {
  func.func @_mha_kernel(%arg0: i32, %arg1: i32, %arg2: i32, %arg3: memref<1x8x32xf32, #tpu.memory_space<vmem>>, %arg4: memref<1x8x32xf32, #tpu.memory_space<vmem>>, %arg5: memref<1x32x8xf32, #tpu.memory_space<vmem>>, %arg6: memref<1x1x8xf32, #tpu.memory_space<vmem>>, %arg7: memref<1x32x8xf32, #tpu.memory_space<vmem>>, %arg8: memref<1x1x8xf32, #tpu.memory_space<vmem>>, %arg9: memref<1x32x8xf32, #tpu.memory_space<vmem>>, %arg10: memref<1x1x8xf32, #tpu.memory_space<vmem>>, %arg11: memref<1x8x32xf32, #tpu.memory_space<vmem>>, %arg12: memref<1x32xf32, #tpu.memory_space<vmem>>, %arg13: memref<1x8x32xf32, #tpu.memory_space<vmem>>, %arg14: memref<4x8x8xf32, #tpu.memory_space<vmem>>, %arg15: memref<4x8x8xf32, #tpu.memory_space<vmem>>, %arg16: memref<8x32xf32, #tpu.memory_space<vmem>>) attributes {dimension_semantics = [#tpu.dimension_semantics<parallel>, #tpu.dimension_semantics<arbitrary>, #tpu.dimension_semantics<arbitrary>], iteration_bounds = array<i64: 2, 1, 4>, scalar_prefetch = 0 : i64, scratch_operands = 3 : i64, tpu.core_type = #tpu.core_type<tc>, window_params = [{transform_indices = @transform_0, window_bounds = array<i64: 1, 8, 32>}, {transform_indices = @transform_1, window_bounds = array<i64: 1, 8, 32>}, {transform_indices = @transform_2, window_bounds = array<i64: 1, 32, 8>}, {transform_indices = @transform_3, window_bounds = array<i64: 1, 1, 8>}, {transform_indices = @transform_4, window_bounds = array<i64: 1, 32, 8>}, {transform_indices = @transform_5, window_bounds = array<i64: 1, 1, 8>}, {transform_indices = @transform_6, window_bounds = array<i64: 1, 32, 8>}, {transform_indices = @transform_7, window_bounds = array<i64: 1, 1, 8>}, {transform_indices = @transform_8, window_bounds = array<i64: 1, 8, 32>}, {pipeline_mode = #tpu.pipeline_mode<synchronous>, transform_indices = @transform_9, window_bounds = array<i64: 1, 32>}, {transform_indices = @transform_10, window_bounds = array<i64: 1, 8, 32>}]} {
    %c0 = arith.constant 0 : index
    %c0_0 = arith.constant 0 : index
    %c0_1 = arith.constant 0 : index
    %0 = vector.load %arg3[%c0, %c0_0, %c0_1] : memref<1x8x32xf32, #tpu.memory_space<vmem>>, vector<1x8x32xf32>
    %1 = vector.shape_cast %0 : vector<1x8x32xf32> to vector<8x32xf32>
    %c0_2 = arith.constant 0 : index
    %c0_3 = arith.constant 0 : index
    %c0_4 = arith.constant 0 : index
    %2 = vector.load %arg5[%c0_2, %c0_3, %c0_4] : memref<1x32x8xf32, #tpu.memory_space<vmem>>, vector<1x32x8xf32>
    %3 = vector.shape_cast %2 : vector<1x32x8xf32> to vector<32x8xf32>
    %c0_5 = arith.constant 0 : index
    %c0_6 = arith.constant 0 : index
    %c0_7 = arith.constant 0 : index
    %4 = vector.load %arg6[%c0_5, %c0_6, %c0_7] : memref<1x1x8xf32, #tpu.memory_space<vmem>>, vector<1x1x8xf32>
    %5 = vector.shape_cast %4 : vector<1x1x8xf32> to vector<1x8xf32>
    %cst = arith.constant dense<0.000000e+00> : vector<8x8xf32>
    %6 = tpu.matmul %1, %3, %cst {dimension_numbers = #tpu.dot_dimension_numbers<[1], [0], [0], [1], [0, 0, 1, 1], [], []>} : vector<8x32xf32>, vector<32x8xf32>, vector<8x8xf32> -> vector<8x8xf32>
    %7 = vector.broadcast %5 : vector<1x8xf32> to vector<8x8xf32>
    %8 = arith.addf %6, %7 : vector<8x8xf32>
    %cst_8 = arith.constant 0.176776692 : f32
    %9 = vector.broadcast %cst_8 : f32 to vector<8x8xf32>
    %10 = arith.mulf %8, %9 : vector<8x8xf32>
    %c0_i32 = arith.constant 0 : i32
    %11 = arith.cmpi eq, %arg1, %c0_i32 : i32
    %12 = arith.extui %11 : i1 to i32
    %c0_i32_9 = arith.constant 0 : i32
    %13 = arith.cmpi ne, %12, %c0_i32_9 : i32
    scf.if %13 {
      %c0_29 = arith.constant 0 : index
      %c0_30 = arith.constant 0 : index
      %c0_31 = arith.constant 0 : index
      %44 = vector.load %arg4[%c0_29, %c0_30, %c0_31] : memref<1x8x32xf32, #tpu.memory_space<vmem>>, vector<1x8x32xf32>
      %45 = vector.shape_cast %44 : vector<1x8x32xf32> to vector<8x32xf32>
      %c0_32 = arith.constant 0 : index
      %c0_33 = arith.constant 0 : index
      %c0_34 = arith.constant 0 : index
      %46 = vector.load %arg7[%c0_32, %c0_33, %c0_34] : memref<1x32x8xf32, #tpu.memory_space<vmem>>, vector<1x32x8xf32>
      %47 = vector.shape_cast %46 : vector<1x32x8xf32> to vector<32x8xf32>
      %cst_35 = arith.constant dense<0.000000e+00> : vector<8x8xf32>
      %48 = tpu.matmul %45, %47, %cst_35 {dimension_numbers = #tpu.dot_dimension_numbers<[1], [0], [0], [1], [0, 0, 1, 1], [], []>} : vector<8x32xf32>, vector<32x8xf32>, vector<8x8xf32> -> vector<8x8xf32>
      %c0_36 = arith.constant 0 : index
      %c0_37 = arith.constant 0 : index
      %c0_38 = arith.constant 0 : index
      %49 = vector.load %arg8[%c0_36, %c0_37, %c0_38] : memref<1x1x8xf32, #tpu.memory_space<vmem>>, vector<1x1x8xf32>
      %50 = vector.shape_cast %49 : vector<1x1x8xf32> to vector<1x8xf32>
      %51 = vector.broadcast %50 : vector<1x8xf32> to vector<8x8xf32>
      %52 = arith.addf %48, %51 : vector<8x8xf32>
      %c0_39 = arith.constant 0 : index
      %c0_40 = arith.constant 0 : index
      %c0_41 = arith.constant 0 : index
      %53 = vector.load %arg9[%c0_39, %c0_40, %c0_41] : memref<1x32x8xf32, #tpu.memory_space<vmem>>, vector<1x32x8xf32>
      %54 = vector.shape_cast %53 : vector<1x32x8xf32> to vector<32x8xf32>
      %cst_42 = arith.constant dense<0.000000e+00> : vector<8x8xf32>
      %55 = tpu.matmul %45, %54, %cst_42 {dimension_numbers = #tpu.dot_dimension_numbers<[1], [0], [0], [1], [0, 0, 1, 1], [], []>} : vector<8x32xf32>, vector<32x8xf32>, vector<8x8xf32> -> vector<8x8xf32>
      %c0_43 = arith.constant 0 : index
      %c0_44 = arith.constant 0 : index
      %c0_45 = arith.constant 0 : index
      %56 = vector.load %arg10[%c0_43, %c0_44, %c0_45] : memref<1x1x8xf32, #tpu.memory_space<vmem>>, vector<1x1x8xf32>
      %57 = vector.shape_cast %56 : vector<1x1x8xf32> to vector<1x8xf32>
      %58 = vector.broadcast %57 : vector<1x8xf32> to vector<8x8xf32>
      %59 = arith.addf %55, %58 : vector<8x8xf32>
      %60 = arith.index_cast %arg2 : i32 to index
      %c0_46 = arith.constant 0 : index
      %c0_47 = arith.constant 0 : index
      %61 = vector.load %arg14[%60, %c0_46, %c0_47] : memref<4x8x8xf32, #tpu.memory_space<vmem>>, vector<1x8x8xf32>
      %62 = vector.shape_cast %61 : vector<1x8x8xf32> to vector<8x8xf32>
      %63 = vector.shape_cast %52 : vector<8x8xf32> to vector<1x8x8xf32>
      tpu.vector_store %arg14[%60, %c0_46, %c0_47], %63 {strides = array<i32>} : memref<4x8x8xf32, #tpu.memory_space<vmem>>, vector<1x8x8xf32>,
      %64 = arith.index_cast %arg2 : i32 to index
      %c0_48 = arith.constant 0 : index
      %c0_49 = arith.constant 0 : index
      %65 = vector.load %arg15[%64, %c0_48, %c0_49] : memref<4x8x8xf32, #tpu.memory_space<vmem>>, vector<1x8x8xf32>
      %66 = vector.shape_cast %65 : vector<1x8x8xf32> to vector<8x8xf32>
      %67 = vector.shape_cast %59 : vector<8x8xf32> to vector<1x8x8xf32>
      tpu.vector_store %arg15[%64, %c0_48, %c0_49], %67 {strides = array<i32>} : memref<4x8x8xf32, #tpu.memory_space<vmem>>, vector<1x8x8xf32>,
    } else {
    }
    %14 = arith.index_cast %arg2 : i32 to index
    %c0_10 = arith.constant 0 : index
    %c0_11 = arith.constant 0 : index
    %15 = vector.load %arg14[%14, %c0_10, %c0_11] : memref<4x8x8xf32, #tpu.memory_space<vmem>>, vector<1x8x8xf32>
    %16 = vector.shape_cast %15 : vector<1x8x8xf32> to vector<8x8xf32>
    %17 = arith.index_cast %arg2 : i32 to index
    %c0_12 = arith.constant 0 : index
    %c0_13 = arith.constant 0 : index
    %18 = vector.load %arg15[%17, %c0_12, %c0_13] : memref<4x8x8xf32, #tpu.memory_space<vmem>>, vector<1x8x8xf32>
    %19 = vector.shape_cast %18 : vector<1x8x8xf32> to vector<8x8xf32>
    %cst_14 = arith.constant dense<0.000000e+00> : vector<8x8xf32>
    %20 = tpu.matmul %10, %16, %cst_14 {dimension_numbers = #tpu.dot_dimension_numbers<[1], [1], [0], [0], [0, 0, 1, 0], [], []>} : vector<8x8xf32>, vector<8x8xf32>, vector<8x8xf32> -> vector<8x8xf32>
    %cst_15 = arith.constant dense<0xFF800000> : vector<8xf32>
    %21 = vector.multi_reduction <maximumf>, %20, %cst_15 [1] : vector<8x8xf32> to vector<8xf32>
    %22 = vector.shape_cast %21 : vector<8xf32> to vector<8x1xf32>
    %23 = vector.broadcast %22 : vector<8x1xf32> to vector<8x8xf32>
    %24 = arith.subf %20, %23 : vector<8x8xf32>
    %25 = math.exp %24 : vector<8x8xf32>
    %cst_16 = arith.constant dense<0.000000e+00> : vector<8xf32>
    %26 = vector.multi_reduction <add>, %25, %cst_16 [1] : vector<8x8xf32> to vector<8xf32>
    %27 = vector.shape_cast %26 : vector<8xf32> to vector<8x1xf32>
    %28 = tpu.reciprocal %27 {approx = true} : vector<8x1xf32> -> vector<8x1xf32>
    %29 = vector.broadcast %28 : vector<8x1xf32> to vector<8x8xf32>
    %30 = arith.mulf %25, %29 : vector<8x8xf32>
    %cst_17 = arith.constant dense<0.000000e+00> : vector<8x8xf32>
    %31 = tpu.matmul %30, %19, %cst_17 {dimension_numbers = #tpu.dot_dimension_numbers<[1], [0], [0], [1], [0, 0, 1, 1], [], []>} : vector<8x8xf32>, vector<8x8xf32>, vector<8x8xf32> -> vector<8x8xf32>
    %c0_i32_18 = arith.constant 0 : i32
    %32 = arith.cmpi eq, %arg2, %c0_i32_18 : i32
    %33 = arith.extui %32 : i1 to i32
    %c0_i32_19 = arith.constant 0 : i32
    %34 = arith.cmpi ne, %33, %c0_i32_19 : i32
    scf.if %34 {
      %cst_29 = arith.constant 0.000000e+00 : f32
      %44 = vector.broadcast %cst_29 : f32 to vector<8x32xf32>
      %c0_30 = arith.constant 0 : index
      %c0_31 = arith.constant 0 : index
      %45 = vector.load %arg16[%c0_30, %c0_31] : memref<8x32xf32, #tpu.memory_space<vmem>>, vector<8x32xf32>
      tpu.vector_store %arg16[%c0_30, %c0_31], %44 {strides = array<i32>} : memref<8x32xf32, #tpu.memory_space<vmem>>, vector<8x32xf32>,
    } else {
    }
    %c0_20 = arith.constant 0 : index
    %c0_21 = arith.constant 0 : index
    %35 = vector.load %arg16[%c0_20, %c0_21] : memref<8x32xf32, #tpu.memory_space<vmem>>, vector<8x32xf32>
    %c0_22 = arith.constant 0 : index
    %c0_23 = arith.constant 0 : index
    %c0_24 = arith.constant 0 : index
    %36 = vector.load %arg11[%c0_22, %c0_23, %c0_24] : memref<1x8x32xf32, #tpu.memory_space<vmem>>, vector<1x8x32xf32>
    %37 = vector.shape_cast %36 : vector<1x8x32xf32> to vector<8x32xf32>
    %cst_25 = arith.constant dense<0.000000e+00> : vector<8x32xf32>
    %38 = tpu.matmul %31, %37, %cst_25 {dimension_numbers = #tpu.dot_dimension_numbers<[1], [0], [0], [1], [0, 0, 1, 1], [], []>} : vector<8x8xf32>, vector<8x32xf32>, vector<8x32xf32> -> vector<8x32xf32>
    %39 = arith.addf %35, %38 : vector<8x32xf32>
    %c0_26 = arith.constant 0 : index
    %c0_27 = arith.constant 0 : index
    %40 = vector.load %arg16[%c0_26, %c0_27] : memref<8x32xf32, #tpu.memory_space<vmem>>, vector<8x32xf32>
    tpu.vector_store %arg16[%c0_26, %c0_27], %39 {strides = array<i32>} : memref<8x32xf32, #tpu.memory_space<vmem>>, vector<8x32xf32>,
    %c3_i32 = arith.constant 3 : i32
    %41 = arith.cmpi eq, %arg2, %c3_i32 : i32
    %42 = arith.extui %41 : i1 to i32
    %c0_i32_28 = arith.constant 0 : i32
    %43 = arith.cmpi ne, %42, %c0_i32_28 : i32
    scf.if %43 {
      %c0_29 = arith.constant 0 : index
      %c0_30 = arith.constant 0 : index
      %44 = vector.load %arg16[%c0_29, %c0_30] : memref<8x32xf32, #tpu.memory_space<vmem>>, vector<8x32xf32>
      %c0_31 = arith.constant 0 : index
      %c0_32 = arith.constant 0 : index
      %45 = vector.load %arg12[%c0_31, %c0_32] : memref<1x32xf32, #tpu.memory_space<vmem>>, vector<1x32xf32>
      %46 = vector.broadcast %45 : vector<1x32xf32> to vector<8x32xf32>
      %47 = arith.addf %44, %46 : vector<8x32xf32>
      %c0_33 = arith.constant 0 : index
      %c0_34 = arith.constant 0 : index
      %c0_35 = arith.constant 0 : index
      %48 = vector.load %arg13[%c0_33, %c0_34, %c0_35] : memref<1x8x32xf32, #tpu.memory_space<vmem>>, vector<1x8x32xf32>
      %49 = vector.shape_cast %48 : vector<1x8x32xf32> to vector<8x32xf32>
      %50 = vector.shape_cast %47 : vector<8x32xf32> to vector<1x8x32xf32>
      tpu.vector_store %arg13[%c0_33, %c0_34, %c0_35], %50 {strides = array<i32>} : memref<1x8x32xf32, #tpu.memory_space<vmem>>, vector<1x8x32xf32>,
    } else {
    }
    return
  }
  func.func @transform_0(%arg0: i32, %arg1: i32, %arg2: i32) -> (i32, i32, i32) {
    %c0_i32 = arith.constant 0 : i32
    %c0_i32_0 = arith.constant 0 : i32
    return %arg0, %arg1, %c0_i32 : i32, i32, i32
  }
  func.func @transform_1(%arg0: i32, %arg1: i32, %arg2: i32) -> (i32, i32, i32) {
    %c0_i32 = arith.constant 0 : i32
    %c0_i32_0 = arith.constant 0 : i32
    %c0_i32_1 = arith.constant 0 : i32
    return %arg0, %c0_i32, %c0_i32_0 : i32, i32, i32
  }
  func.func @transform_2(%arg0: i32, %arg1: i32, %arg2: i32) -> (i32, i32, i32) {
    %c0_i32 = arith.constant 0 : i32
    %c0_i32_0 = arith.constant 0 : i32
    %c0_i32_1 = arith.constant 0 : i32
    return %arg2, %c0_i32, %c0_i32_0 : i32, i32, i32
  }
  func.func @transform_3(%arg0: i32, %arg1: i32, %arg2: i32) -> (i32, i32, i32) {
    %c0_i32 = arith.constant 0 : i32
    %c0_i32_0 = arith.constant 0 : i32
    %c0_i32_1 = arith.constant 0 : i32
    return %arg2, %c0_i32, %c0_i32_0 : i32, i32, i32
  }
  func.func @transform_4(%arg0: i32, %arg1: i32, %arg2: i32) -> (i32, i32, i32) {
    %c0_i32 = arith.constant 0 : i32
    %c0_i32_0 = arith.constant 0 : i32
    %c0_i32_1 = arith.constant 0 : i32
    return %arg2, %c0_i32, %c0_i32_0 : i32, i32, i32
  }
  func.func @transform_5(%arg0: i32, %arg1: i32, %arg2: i32) -> (i32, i32, i32) {
    %c0_i32 = arith.constant 0 : i32
    %c0_i32_0 = arith.constant 0 : i32
    %c0_i32_1 = arith.constant 0 : i32
    return %arg2, %c0_i32, %c0_i32_0 : i32, i32, i32
  }
  func.func @transform_6(%arg0: i32, %arg1: i32, %arg2: i32) -> (i32, i32, i32) {
    %c0_i32 = arith.constant 0 : i32
    %c0_i32_0 = arith.constant 0 : i32
    %c0_i32_1 = arith.constant 0 : i32
    return %arg2, %c0_i32, %c0_i32_0 : i32, i32, i32
  }
  func.func @transform_7(%arg0: i32, %arg1: i32, %arg2: i32) -> (i32, i32, i32) {
    %c0_i32 = arith.constant 0 : i32
    %c0_i32_0 = arith.constant 0 : i32
    %c0_i32_1 = arith.constant 0 : i32
    return %arg2, %c0_i32, %c0_i32_0 : i32, i32, i32
  }
  func.func @transform_8(%arg0: i32, %arg1: i32, %arg2: i32) -> (i32, i32, i32) {
    %c0_i32 = arith.constant 0 : i32
    %c0_i32_0 = arith.constant 0 : i32
    %c0_i32_1 = arith.constant 0 : i32
    return %arg2, %c0_i32, %c0_i32_0 : i32, i32, i32
  }
  func.func @transform_9(%arg0: i32, %arg1: i32, %arg2: i32) -> (i32, i32) {
    %c0_i32 = arith.constant 0 : i32
    %c0_i32_0 = arith.constant 0 : i32
    %c0_i32_1 = arith.constant 0 : i32
    return %c0_i32, %c0_i32_0 : i32, i32
  }
  func.func @transform_10(%arg0: i32, %arg1: i32, %arg2: i32) -> (i32, i32, i32) {
    %c0_i32 = arith.constant 0 : i32
    %c0_i32_0 = arith.constant 0 : i32
    return %arg0, %arg1, %c0_i32 : i32, i32, i32
  }
}

</mosaic_0001>

<bundles_post_ra>
// kernel: tpu_custom_call.1
= control target key start
LH: loop header
LB: loop body
LE: loop exit
PB: predicated region body
PF: predicated region fallthrough
CT: control target
= control target key end

     0   :  { %15 = vsyncpa [#allocation6], 0  ;;  %s1790_s0 = inlined_call_operand.vmem [shape: f32[2,8,32], index: 0, kind: input, shape index: {}]   ;;  %s1791_s1 = inlined_call_operand.vmem [shape: f32[2,8,32], index: 1, kind: input, shape index: {}]   ;;  %s1792_s2 = inlined_call_operand.vmem [shape: f32[4,32,8], index: 2, kind: input, shape index: {}]   ;;  %s1793_s3 = inlined_call_operand.vmem [shape: f32[4,1,8], index: 3, kind: input, shape index: {}]   ;;  %s1794_s4 = inlined_call_operand.vmem [shape: f32[4,32,8], index: 4, kind: input, shape index: {}]   ;;  %s1795_s5 = inlined_call_operand.vmem [shape: f32[4,1,8], index: 5, kind: input, shape index: {}]   ;;  %s1796_s6 = inlined_call_operand.vmem [shape: f32[4,32,8], index: 6, kind: input, shape index: {}]   ;;  %s1797_s7 = inlined_call_operand.vmem [shape: f32[4,1,8], index: 7, kind: input, shape index: {}]   ;;  %s1798_s8 = inlined_call_operand.vmem [shape: f32[4,8,32], index: 8, kind: input, shape index: {}]   ;;  %s1799_s9 = inlined_call_operand.vmem [shape: f32[1,32], index: 9, kind: input, shape index: {}]   ;;  %s1800_s10 = inlined_call_operand.hbm [shape: f32[2,8,32], index: 10, kind: output, shape index: {}]  }
   0x1   :  { %17 = vsyncpa [#allocation6 + $0x1], 0  ;;  %s1572_s13 = smov 0   ;;  %s1574_s14 = smov 0  }
   0x2   :  { %s1576_s15 = smov 0   ;;  %s1578_s16 = smov 0  }
   0x3   :  { %s1580_s17 = smov 0   ;;  %s1582_s18 = smov 0  }
   0x4   :  { %s1584_s19 = smov 0   ;;  %s1586_s20 = smov 0  }
   0x5 LB: > { %1808 = sst [smem:[#allocation8_spill]] %s1483_s13  ;;  %s1235_s21 = sadd.s32 4294967295, %s1511_s20   ;;  %s1511_s20 = sphi %s1586_s20, %s23_s20   ;;  %s1507_s19 = sphi %s1584_s19, %s1826_s19   ;;  %s1503_s18 = sphi %s1582_s18, %s1825_s18   ;;  %s1499_s17 = sphi %s1580_s17, %s1824_s17   ;;  %s1495_s16 = sphi %s1578_s16, %s1823_s16   ;;  %s1491_s15 = sphi %s1576_s15, %s1822_s15   ;;  %s1487_s14 = sphi %s1574_s14, %s1828_s14   ;;  %s1483_s13 = sphi %s1572_s13, %s1827_s13  }
   0x6   : > { %1809 = sst [smem:[#allocation9_spill]] %s1491_s15  ;;  %s1236_s22 = sadd.s32 4294967294, %s1511_s20  }
   0x7   : > { %1810 = sst [smem:[#allocation10_spill]] %s1503_s18  ;;  %s35_s23 = sadd.s32 1, %s1503_s18 }
   0x8   : > { %1811 = sst [smem:[#allocation11_spill]] %s1507_s19  ;;  %p36_p0 = scmp.ge.s32.totalorder %s35_s23, 4 }
   0x9   : > { %s42_s24 = sadd.s32 1, %s1507_s19  ;;  %p318_p1 = scmp.ne.s32.totalorder %s1491_s15, %s1487_s14 }
   0xa   : > { %p319_p2 = scmp.eq.s32.totalorder %s1235_s21, 7  ;;  %s1830_s23 = smov (%p36_p0, %s35_s23), 0 }
   0xb   : > { %1812 = sst [smem:[#allocation12_spill]] %s1830_s23  ;;  %s1832_s24 = smov (!%p36_p0, %s42_s24), %s1507_s19 }
   0xc   : > { %p1621_p3 = por %p319_p2, %p318_p1  ;;  %p324_p4 = scmp.ne.s32.totalorder %s1487_s14, %s1483_s13 }
   0xd   : > { %p44_p5 = scmp.ge.s32.totalorder %s1832_s24, 2  ;;  %p325_p6 = scmp.eq.s32.totalorder %s1236_s22, 7 }
   0xe   : > { %p1239_p7 = scmp.ge.s32.totalorder %s1511_s20, 1  ;;  %p412_p8 = scmp.lt.s32.totalorder %s1511_s20, 9 }
   0xf   : > { %s1834_s24 = smov (%p44_p5, %s1832_s24), 0  ;;  %p1631_p9 = por %p325_p6, %p324_p4 }
  0x10   : > { %1814 = sst [smem:[#allocation13_spill]] %s1834_s24  ;;  %p413_p10 = pnand %p1239_p7, %p412_p8 }
  0x11   : > { %s1815_s26 = scalar_select %p1631_p9, 1, 0 }
  0x12   : > { %s303_s27 = ssub.s32 %s1507_s19, %s1834_s24  ;;  %s308_s28 = sadd.s32 1, %s1491_s15 }
  0x13   : > { %1816 = sst [smem:[#allocation14_spill]] %s1815_s26  ;;  %p306_p11 = scmp.eq.s32.totalorder %s303_s27, 0 }
  0x14   : > { %416 = sbr.rel (%p413_p10) target bundleno = 1177 (0x499), region = 60  ;;  %p495_p12 = scmp.lt.s32.totalorder (!%p413_p10), %s1495_s16, 3 }
  0x15   : > { %s1639_s29 = scalar_select %p306_p11, %s1491_s15, %s308_s28  }
  0x16   : > { %s1801_s30 = sand.u32 (!%p413_p10), 1, %s1487_s14   ;;  %p484_p13 = scmp.lt.s32.totalorder (!%p413_p10), %s1499_s17, 1 }
  0x17   : > { %1817 = sst [smem:[#allocation15_spill]] %s1639_s29  ;;  %s1648_s11 = sshll.u32 (!%p413_p10), %s1801_s30, 3 }
  0x18   : > { %p1261_p0 = scmp.ne.s32.totalorder (!%p413_p10), %s1495_s16, 0 }
  0x19   : > { %v1513_v0 = vmov 0.0   ;;  %vm1514_vm0 = vmmov 0   ;;  %s1652_s12 = scalar_select %p495_p12, %s1495_s16, 3  ;;  %vm535_vm1 = vcmask 261120   ;;  %vm782_vm2 = vcmask 64512  }
  0x1a   : > { %1304 = vmatprep.subr.mxu1 %v1513_v0  ;;  %1312 = vmatprep.mubr.msk.f32.mxu1 %vm1514_vm0, %v1513_v0  ;;  %s485_s18 = scalar_select %p484_p13, %s1499_s17, 1 }
  0x1b   : > { %1293 = vmatprep.subr.mxu0 %v1513_v0  ;;  %1301 = vmatprep.mubr.msk.f32.mxu0 %vm1514_vm0, %v1513_v0  ;;  %s1658_s21 = sshll.u32 %s1652_s12, 5  ;;  %s1249_s22 = sshll.u32 %s1652_s12, 3 }
  0x1c   : > { %s507_s30 = scalar_lea.vmem %s1794_s4, %s1658_s21  ;;  %s1668_s19 = scalar_lea.vmem %s1798_s8, %s1249_s22 }
  0x1d   : > { %v618_v1 = vld [vmem:[%s507_s30 + $0x18] sm:$0xff]  ;;  %v617_v2 = vld [vmem:[%s507_s30 + $0x10] sm:$0xff]  ;;  %s499_s26 = scalar_lea.vmem %s1792_s2, %s1658_s21  ;;  %v616_v3 = vld [vmem:[%s507_s30 + $0x8] sm:$0xff]  ;;  %s1241_s13 = sshll.u32 %s485_s18, 3 }
  0x1e   : > { %1305 = vmatpush3.msra.mxu1 %v618_v1  ;;  %v527_v4 = vld [vmem:[%s499_s26 + $0x18] sm:$0xff]  ;;  %v526_v5 = vld [vmem:[%s499_s26 + $0x10] sm:$0xff]  ;;  %s494_s23 = scalar_lea.vmem %s1791_s1, %s1241_s13  ;;  %v615_v6 = vld [vmem:[%s507_s30] sm:$0xff]  ;;  %s490_s29 = scalar_lea.vmem %s1790_s0, %s1241_s13 }
  0x1f   : > { %1306 = vmatprep.subr.mxu1 %v1513_v0  ;;  %1294 = vmatpush3.msra.mxu0 %v527_v4  ;;  %v525_v7 = vld [vmem:[%s499_s26 + $0x8] sm:$0xff]  ;;  %v614_v8 = vld [vmem:[%s494_s23] sm:$0xff]  ;;  %s1256_s30 = sshll.u32 %s1495_s16, 3  ;;  %s502_s28 = scalar_lea.vmem %s1793_s3, %s1652_s12 }
  0x20   : > { %1307 = vmatpush3.msra.mxu1 %v617_v2  ;;  %1295 = vmatprep.subr.mxu0 %v1513_v0  ;;  %v524_v9 = vld [vmem:[%s499_s26] sm:$0xff]  ;;  %s510_s26 = scalar_lea.vmem %s1795_s5, %s1652_s12  ;;  %s781_s23 = scalar_lea.vmem [#allocation2], %s1256_s30 }
  0x21   : > { %1308 = vmatprep.subr.mxu1 %v1513_v0  ;;  %1296 = vmatpush3.msra.mxu0 %v526_v5  ;;  %v523_v10 = vld [vmem:[%s490_s29] sm:$0xff]  ;;  %s515_s29 = scalar_lea.vmem %s1796_s6, %s1658_s21  ;;  %s518_s18 = scalar_lea.vmem %s1797_s7, %s1652_s12 }
  0x22   : > { %1309 = vmatpush3.msra.mxu1 %v616_v3  ;;  %1297 = vmatprep.subr.mxu0 %v1513_v0  ;;  %v1252_v11 = vld [vmem:[%s510_s26] ss:$0 sm:$0xff]  ;;  %v702_v21 = vld [vmem:[%s515_s29 + $0x18] sm:$0xff]  ;;  %v701_v22 = vld [vmem:[%s515_s29 + $0x10] sm:$0xff]  ;;  %s784_s26 = scalar_lea.vmem [#allocation3], %s1256_s30  ;;  %s483_s12 = scalar_lea.vmem [#allocation5], %s1648_s11 }
  0x23   : > { %1310 = vmatprep.subr.mxu1 %v1513_v0  ;;  %1298 = vmatpush3.msra.mxu0 %v525_v7  ;;  %v1250_v16 = vld [vmem:[%s502_s28] ss:$0 sm:$0xff]  ;;  %v700_v23 = vld [vmem:[%s515_s29 + $0x8] sm:$0xff] }
  0x24   : > { %1311 = vmatpush3.msra.mxu1 %v615_v6  ;;  %1299 = vmatprep.subr.mxu0 %v1513_v0  ;;  %v699_v24 = vld [vmem:[%s515_s29] sm:$0xff] }
  0x25   : > { %1313 = vmatmul.mubr.msk.f32.vlgmr.msra.gmra.mxu1 %vm535_vm1, %v614_v8  ;;  %1300 = vmatpush3.msra.mxu0 %v524_v9  ;;  %v1254_v34 = vld [vmem:[%s518_s18] ss:$0 sm:$0xff] }
  0x26   : > { %1326 = vmatprep.subr.mxu1 %v1513_v0  ;;  %1302 = vmatmul.mubr.msk.f32.vlgmr.msra.gmra.mxu0 %vm535_vm1, %v523_v10 }
  0x27   : > { %1328 = vmatprep.mubr.msk.f32.mxu1 %vm1514_vm0, %v1513_v0  ;;  %1315 = vmatprep.subr.mxu0 %v1513_v0 }
  0x28   : > { %1323 = vmatprep.mubr.msk.f32.mxu0 %vm1514_vm0, %v1513_v0  ;;  %1316 = vmatpush3.msra.mxu0 %v702_v21 }
  0x29   : > { %1317 = vmatprep.subr.mxu0 %v1513_v0 }
  0x2a   : > { %1318 = vmatpush3.msra.mxu0 %v701_v22 }
  0x2b   : > { %1319 = vmatprep.subr.mxu0 %v1513_v0 }
  0x2c   : > { %1320 = vmatpush3.msra.mxu0 %v700_v23 }
  0x2d   : > { %1321 = vmatprep.subr.mxu0 %v1513_v0 }
  0x2e   : > { %1322 = vmatpush3.msra.mxu0 %v699_v24 }
  0x2f   : > { %1324 = vmatmul.mubr.msk.f32.vlgmr.msra.gmra.mxu0 %vm535_vm1, %v614_v8 }
  0xe5   : > { %v695_v12 = vpop.f32.mrf.mxu1 }
  0xe6   : > { %v696_v13 = vadd.f32 %v1252_v11, %v695_v12  ;;  %v605_v15 = vpop.f32.mrf.mxu0 }
  0xe7   : > { %v1314_v14 = vpop.f32.mrf.mxu1  ;;  %v606_v18 = vadd.f32 %v1250_v16, %v605_v15 }
  0xe8   : > { %783 = vst.msk [vmem:[%s781_s23] sm:$0xff] %vm782_vm2, %v696_v13  ;;  %v1303_v17 = vpop.f32.mrf.mxu0 }
  0xe9   : > { %v609_v19 = vmul.f32 0.17677669, %v606_v18 }
  0xef   : > { %v788_v20 = vld [vmem:[%s781_s23] sm:$0xff]  ;;  %v776_v33 = vpop.f32.mrf.mxu0 }
  0xf0   : > { %1327 = vmatpush3.xpose.msk.msra.mxu1 %vm782_vm2, %v788_v20  ;;  %v777_v35 = vadd.f32 %v1254_v34, %v776_v33 }
  0xf1   : > { %1331 = vmatprep.subr.mxu1 %v1513_v0  ;;  %v1325_v36 = vpop.f32.mrf.mxu0 }
  0xf2   : > { %785 = vst.msk [vmem:[%s784_s26] sm:$0xff] %vm782_vm2, %v777_v35 }
  0xf3   : > { %1329 = vmatmul.mubr.msk.f32.vlgmr.msra.gmra.mxu1 %vm782_vm2, %v609_v19 }
  0xf4   : > { %1333 = vmatprep.mubr.msk.f32.mxu1 %vm1514_vm0, %v1513_v0 }
  0xf9   : > { %v790_v37 = vld [vmem:[%s784_s26] sm:$0xff] }
  0xfa   : > { %1332 = vmatpush3.msra.mxu1 %v790_v37 }
 0x1b3   : > { %v864_v25 = vpop.f32.mrf.mxu1 }
 0x1b4   : > { %v868_v26 = vsel %vm782_vm2, %v864_v25, -inf }
 0x1b5   : > { %869 = vmax.xlane.f32.xlu0 %v868_v26  ;;  %v1330_v27 = vpop.f32.mrf.mxu1 }
 0x23e   : > { %v870_v28 = vpop.xlane.xlu0 %869 }
 0x23f   : > { %v871_v29 = vsub.f32 %v864_v25, %v870_v28 }
 0x241   : > { %v872_v30 = vmul.f32 1.442695, %v871_v29 }
 0x243   : > { %1415 = vpow2.f32 %v872_v30 }
 0x250   : > { %v1416_v31 = vpop.eup %1415 }
 0x251   : > { %v874_v32 = vsel %vm782_vm2, %v1416_v31, 0.0 }
 0x252   : > { %875 = vadd.xlane.f32.xlu0 %v874_v32 }
 0x2db   : > { %v876_v38 = vpop.xlane.xlu0 %875 }
 0x2dc   : > { %1417 = vrcp.f32 %v876_v38 }
 0x2e9   : > { %v1418_v39 = vpop.eup %1417 }
 0x2ea   : > { %v878_v40 = vmul.f32 %v1418_v39, %v1416_v31 }
 0x2ec   : > { %1334 = vmatmul.mubr.msk.f32.vlgmr.msra.gmra.mxu1 %vm782_vm2, %v878_v40 }
 0x3aa   : > { %955 = sbr.rel (%p1261_p0) target bundleno = 945 (0x3b1), region = 68 }
 0x3ac   : > { %v948_v41 = vpop.f32.mrf.mxu1 }
 0x3ae   : > { %v1335_v42 = vpop.f32.mrf.mxu1 }
 0x3af   : > { %v1515_v43 = vmov 0.0  }
 0x3b0   : > { %956 = vst.msk [vmem:[#allocation4] sm:$0xff] %vm535_vm1, %v1515_v43 }
 0x3b1 PF: > { %1336 = vmatprep.subr.mxu0 %v1513_v0  ;;  %v958_v44 = vld [vmem:[%s1668_s19] sm:$0xff]  ;;  %1338 = vmatprep.mubr.msk.f32.mxu0 %vm1514_vm0, %v1513_v0  ;;  %p1263_p1 = scmp.ne.s32.totalorder %s1495_s16, 3 }
 0x3b2   : > { %1337 = vmatpush3.msra.mxu0 %v958_v44 }
 0x3b3   : > { %1339 = vmatmul.mubr.msk.f32.vlgmr.msra.gmra.mxu0 %vm782_vm2, %v948_v41 }
 0x3b7   : > { %v957_v45 = vld [vmem:[#allocation4] sm:$0xff] }
 0x472   : > { %1037 = sbr.rel (%p1263_p1) target bundleno = 1153 (0x481), region = 72 }
 0x473   : > { %v1028_v46 = vpop.f32.mrf.mxu0 }
 0x474   : > { %v1032_v47 = vadd.f32 %v1028_v46, %v957_v45 }
 0x475   : > { %v1340_v48 = vpop.f32.mrf.mxu0 }
 0x476   : > { %1033 = vst.msk [vmem:[#allocation4] sm:$0xff] %vm535_vm1, %v1032_v47 }
 0x477   : > { %v1264_v50 = vld [vmem:[%s1799_s9] ss:$0 sm:$0xff] }
 0x47d   : > { %v1038_v49 = vld [vmem:[#allocation4] sm:$0xff] }
 0x47e   : > { %v1046_v51 = vadd.f32 %v1264_v50, %v1038_v49 }
 0x480   : > { %1047 = vst.msk [vmem:[%s483_s12] sm:$0xff] %vm535_vm1, %v1046_v51 }
 0x481 PF: > { %s1266_s19 = sshll.u32 %s1499_s17, 7  ;;  %s1063_s23 = sshll.u32 %s483_s12, 4  ;;  %s1064_s23 = int_to_ptr.vmem [resolvable:$true] %s1063_s23 }
 0x482   : > { %s1061_s28 = scalar_lea.hbm %s1800_s10, %s1266_s19  ;;  %s1818_s16 = sand.u32 1, %s1487_s14  }
 0x483   : > { %s1049_s15 = scalar_lea.sflag [#allocation6], %s1818_s16  ;;  %s1419_s24 = scalar_lea.vmem %s1064_s23, 128 }
 0x484   : > { %p1420_p2 = scmp.ne.s32.totalorder %s1064_s23, %s1419_s24  ;;  %s1516_s29 = smov [#allocation5]  }
 0x485   : > { %s1423_s21 = sshll.u32 %s1516_s29, 4  ;;  %s1424_s21 = int_to_ptr.vmem [resolvable:$false] %s1423_s21 }
 0x486   : > { %p1421_p4 = pnand %p1420_p2, %p1621_p3  ;;  %s1425_s13 = scalar_lea.vmem %s1424_s21, 256 }
 0x487   : > { %p1426_p6 = scmp.lt.s32.totalorder %s1064_s23, %s1424_s21  ;;  %p1427_p7 = scmp.lt.s32.totalorder %s1425_s13, %s1419_s24 }
 0x488   : > { %p1422_p5 = pneg %p1421_p4 }
 0x489   : > { %p1428_p8 = por %p1427_p7, %p1426_p6 }
 0x48b   : > { %p1429_p10 = pnand %p1428_p8, %p1422_p5 }
 0x48d   : > { %1432 = shalt.err (!%p1429_p10)
}
 0x48e   : > { %s1433_s17 = scalar_lea.hbm %s1061_s28, 128  ;;  %s1437_s12 = scalar_lea.hbm %s1800_s10, 256 }
 0x48f   : > { %p1434_p11 = scmp.ne.s32.totalorder %s1061_s28, %s1433_s17  ;;  %p1438_p0 = scmp.lt.s32.totalorder %s1061_s28, %s1800_s10 }
 0x490   : > { %p1439_p1 = scmp.lt.s32.totalorder %s1437_s12, %s1433_s17 }
 0x491   : > { %p1435_p12 = pnand %p1434_p11, %p1621_p3 }
 0x492   : > { %p1440_p2 = por %p1439_p1, %p1438_p0 }
 0x493   : > { %p1436_p13 = pneg %p1435_p12 }
 0x495   : > { %p1441_p4 = pnand %p1440_p2, %p1436_p13 }
 0x497   : > { %1444 = shalt.err (!%p1441_p4)
}
 0x498   : > { %1341 = dma.vmem_to_hbm [thread:$0]  (%p1621_p3), %s1064_s23, 128, %s1061_s28, %s1049_s15  }
 0x499 PF: > { %s1819_s19 = sld [smem:[#allocation8_spill]]  ;;  %p1347_p5 = scmp.ge.s32.totalorder %s1511_s20, 2 }
 0x49b   : > { %p1344_p6 = pnand %p1347_p5, %p1631_p9 }
 0x49d   : > { %p1345_p7 = pneg %p1344_p6 }
 0x49f   : > { %s1075_s27 = sand.u32 1, %s1819_s19  }
 0x4a0   : > { %s1076_s16 = scalar_lea.sflag [#allocation6], %s1075_s27 }
 0x4a1   : > { %1478 = dma.done.wait (%p1345_p7), %s1076_s16, 128  }
 0x4a2   : > { %1480 = vsyncadd (%p1345_p7), %s1076_s16, 4294967168  ;;  %s23_s20 = sadd.s32 1, %s1511_s20   ;;  %s1821_s24 = sld [smem:[#allocation9_spill]] }
 0x4a3   : > { %p20_p8 = scmp.ge.s32.totalorder %s23_s20, 10   ;;  %s1822_s15 = sld [smem:[#allocation15_spill]] }
 0x4a4   : > { %s1823_s16 = sld [smem:[#allocation10_spill]]  ;;  %s1827_s13 = smov %s1487_s14 }
 0x4a5   : > { %s1824_s17 = sld [smem:[#allocation11_spill]]  ;;  %22 = sbr.rel (!%p20_p8) target bundleno = 5 (0x5), region = 135 }
 0x4a6   : > { %s1825_s18 = sld [smem:[#allocation12_spill]] }
 0x4a7   : > { %s1826_s19 = sld [smem:[#allocation13_spill]] }
 0x4a8   : > { %s1828_s14 = smov %s1821_s24 }
 0x4aa   :  { %1081 = vsyncpa [#allocation6], 1 }
 0x4ab   :  { %1083 = vsyncpa [#allocation6 + $0x1], 1 }

</bundles_post_ra>
